<compile_context>
chip_gen: v7x
topology: tpu7x:2x2x1
jax: 0.10.0
libtpu: 0.0.40
codegen_flags: <defaults>
</compile_context>

<pallas_src>
import math

import jax
import jax.numpy as jnp
from jax.experimental import pallas as pl
from jax.experimental.pallas import tpu as pltpu

_HIDDEN = 256
_LANE = 128


def _round_up(x, m):
    return (x + m - 1) // m * m


def _qnet_kernel(x_ref, w1_ref, b1_ref, w2_ref, b2_ref, w3_ref, b3_ref, o_ref):
    # Layer 1: Linear(state_size, 256) + ReLU  (bf16 MXU inputs, f32 accumulation)
    h1 = jnp.dot(x_ref[...], w1_ref[...], preferred_element_type=jnp.float32)
    h1 = jnp.maximum(h1 + b1_ref[...], 0.0).astype(w2_ref.dtype)

    # Layer 2: Linear(256, 256) + ReLU
    h2 = jnp.dot(h1, w2_ref[...], preferred_element_type=jnp.float32)
    h2 = jnp.maximum(h2 + b2_ref[...], 0.0).astype(w3_ref.dtype)

    # Layer 3: Linear(256, padded_action) — lane-dense 128-wide store, bf16 writeback
    out = jnp.dot(h2, w3_ref[...], preferred_element_type=jnp.float32)
    o_ref[...] = (out + b3_ref[...]).astype(o_ref.dtype)


def _batch_dim_semantics(n_steps):
    """CORE_PARALLEL on v7x (2 TCs/chip) when there is work to shard; otherwise the
    plain 'parallel' tag (no-op on single-TC v5e/v6e)."""
    try:
        kind = jax.devices()[0].device_kind.lower()
    except Exception:  # pragma: no cover - defensive
        kind = ""
    if "v7" in kind and n_steps >= 2:
        return (pltpu.CORE_PARALLEL,)
    return ("parallel",)


def qnetwork_forward(x, params, action_size, *, block_batch=2048):
    """x: (batch, state_size) float32/bfloat16. params: dict from init_qnetwork_params.
    Returns (batch, action_size) float32 Q-values (matches PyTorch semantics up to the
    documented bf16 activation/output rounding)."""
    w1, b1, w2, b2, w3, b3 = (params["w1"], params["b1"], params["w2"],
                              params["b2"], params["w3"], params["b3"])
    batch, state_size = x.shape
    a_pad = w3.shape[1]  # action dim padded to a multiple of 128 at init

    # Batch tiling: pick tb to minimize padding (16-row granule == bf16 sublane tile),
    # capped by block_batch; weights/biases stay VMEM-resident across grid steps.
    n_steps = max(1, pl.cdiv(batch, block_batch))
    tb = _round_up(pl.cdiv(batch, n_steps), 16)
    batch_pad = tb * n_steps
    if batch_pad != batch:
        x = jnp.pad(x, ((0, batch_pad - batch), (0, 0)))
    x = x.astype(w1.dtype)  # bf16 input: bf16 MXU rate + half the activation DMA

    out_dtype = jnp.bfloat16  # halve the (tb, 128) output writeback; upcast below
    flops = 2 * batch_pad * (state_size * _HIDDEN + _HIDDEN * _HIDDEN + _HIDDEN * a_pad)
    bytes_accessed = (x.size * x.dtype.itemsize
                      + sum(p.size * p.dtype.itemsize for p in (w1, b1, w2, b2, w3, b3))
                      + batch_pad * a_pad * jnp.dtype(out_dtype).itemsize)

    def resident(a):
        # Same block for every grid step -> stays in VMEM across the batch loop.
        return pl.BlockSpec(a.shape, lambda i: (0,) * a.ndim)

    out_pad = pl.pallas_call(
        _qnet_kernel,
        out_shape=jax.ShapeDtypeStruct((batch_pad, a_pad), out_dtype),
        grid=(n_steps,),
        in_specs=[pl.BlockSpec((tb, state_size), lambda i: (i, 0)),
                  resident(w1), resident(b1),
                  resident(w2), resident(b2),
                  resident(w3), resident(b3)],
        out_specs=pl.BlockSpec((tb, a_pad), lambda i: (i, 0)),
        compiler_params=pltpu.CompilerParams(
            dimension_semantics=_batch_dim_semantics(n_steps),
            vmem_limit_bytes=48 << 20),
        cost_estimate=pl.CostEstimate(flops=flops, transcendentals=0,
                                      bytes_accessed=bytes_accessed),
    )(x, w1, b1, w2, b2, w3, b3)

    # Drop batch padding and the zero-padded action lanes (so downstream argmax can
    # never pick a padded action); upcast back to f32 for the caller.
    return out_pad[:batch, :action_size].astype(jnp.float32)


def init_qnetwork_params(key, state_size, action_size, hidden=_HIDDEN,
                         param_dtype=jnp.bfloat16):
    """PyTorch default Linear init: U(-1/sqrt(fan_in), 1/sqrt(fan_in)).
    Weights stored as (in, out) (so the kernel does x @ W == x @ W_pt.T),
    output layer zero-padded to a multiple of 128 lanes, weights in bf16,
    biases kept f32 (added to the f32 accumulator)."""
    a_pad = max(_LANE, _round_up(action_size, _LANE))

    def linear_init(k, fan_in, fan_out, pad_out):
        kw, kb = jax.random.split(k)
        bound = 1.0 / math.sqrt(fan_in)
        w = jax.random.uniform(kw, (fan_in, fan_out), jnp.float32, -bound, bound)
        b = jax.random.uniform(kb, (1, fan_out), jnp.float32, -bound, bound)
        if pad_out != fan_out:
            w = jnp.pad(w, ((0, 0), (0, pad_out - fan_out)))
            b = jnp.pad(b, ((0, 0), (0, pad_out - fan_out)))
        return w.astype(param_dtype), b.astype(jnp.float32)

    k1, k2, k3 = jax.random.split(key, 3)
    w1, b1 = linear_init(k1, state_size, hidden, hidden)
    w2, b2 = linear_init(k2, hidden, hidden, hidden)
    w3, b3 = linear_init(k3, hidden, action_size, a_pad)
    return {"w1": w1, "b1": b1, "w2": w2, "b2": b2, "w3": w3, "b3": b3}


def _reference(x, params, action_size):
    """Plain-JAX forward with the exact same bf16/f32 cast chain as the kernel."""
    h = jnp.dot(x.astype(params["w1"].dtype), params["w1"],
                preferred_element_type=jnp.float32) + params["b1"]
    h = jnp.maximum(h, 0.0).astype(params["w2"].dtype)
    h = jnp.dot(h, params["w2"], preferred_element_type=jnp.float32) + params["b2"]
    h = jnp.maximum(h, 0.0).astype(params["w3"].dtype)
    out = jnp.dot(h, params["w3"], preferred_element_type=jnp.float32) + params["b3"]
    out = out.astype(jnp.bfloat16).astype(jnp.float32)  # mirror kernel's bf16 writeback
    return out[:, :action_size]


if __name__ == "__main__":
    key = jax.random.PRNGKey(0)
    k_params, k_x = jax.random.split(key)

    batch, state_size, action_size = 8, 8, 4
    params = init_qnetwork_params(k_params, state_size, action_size)
    x = jax.random.normal(k_x, (batch, state_size), dtype=jnp.float32)

    out = qnetwork_forward(x, params, action_size)
    out = jax.block_until_ready(out)

    ref = _reference(x, params, action_size)
    assert out.shape == (batch, action_size), out.shape
    assert jnp.allclose(out, ref, atol=1e-2, rtol=1e-2), (
        float(jnp.max(jnp.abs(out - ref))))

    print("KERNEL_OK")
</pallas_src>

<mosaic_0001>
module attributes {stable_mosaic.version = 11 : i64} {
  func.func @_qnet_kernel(%arg0: i32, %arg1: memref<16x8xbf16, #tpu.memory_space<vmem>>, %arg2: memref<8x256xbf16, #tpu.memory_space<vmem>>, %arg3: memref<1x256xf32, #tpu.memory_space<vmem>>, %arg4: memref<256x256xbf16, #tpu.memory_space<vmem>>, %arg5: memref<1x256xf32, #tpu.memory_space<vmem>>, %arg6: memref<256x128xbf16, #tpu.memory_space<vmem>>, %arg7: memref<1x128xf32, #tpu.memory_space<vmem>>, %arg8: memref<16x128xbf16, #tpu.memory_space<vmem>>) attributes {dimension_semantics = [#tpu.dimension_semantics<parallel>], iteration_bounds = array<i64: 1>, scalar_prefetch = 0 : i64, scratch_operands = 0 : i64, tpu.core_type = #tpu.core_type<tc>, window_params = [{transform_indices = @transform_0, window_bounds = array<i64: 16, 8>}, {pipeline_mode = #tpu.pipeline_mode<synchronous>, transform_indices = @transform_1, window_bounds = array<i64: 8, 256>}, {pipeline_mode = #tpu.pipeline_mode<synchronous>, transform_indices = @transform_2, window_bounds = array<i64: 1, 256>}, {pipeline_mode = #tpu.pipeline_mode<synchronous>, transform_indices = @transform_3, window_bounds = array<i64: 256, 256>}, {pipeline_mode = #tpu.pipeline_mode<synchronous>, transform_indices = @transform_4, window_bounds = array<i64: 1, 256>}, {pipeline_mode = #tpu.pipeline_mode<synchronous>, transform_indices = @transform_5, window_bounds = array<i64: 256, 128>}, {pipeline_mode = #tpu.pipeline_mode<synchronous>, transform_indices = @transform_6, window_bounds = array<i64: 1, 128>}, {transform_indices = @transform_7, window_bounds = array<i64: 16, 128>}]} {
    %c0 = arith.constant 0 : index
    %c0_0 = arith.constant 0 : index
    %0 = vector.load %arg1[%c0, %c0_0] : memref<16x8xbf16, #tpu.memory_space<vmem>>, vector<16x8xbf16>
    %c0_1 = arith.constant 0 : index
    %c0_2 = arith.constant 0 : index
    %1 = vector.load %arg2[%c0_1, %c0_2] : memref<8x256xbf16, #tpu.memory_space<vmem>>, vector<8x256xbf16>
    %cst = arith.constant dense<0.000000e+00> : vector<16x256xf32>
    %2 = tpu.matmul %0, %1, %cst {dimension_numbers = #tpu.dot_dimension_numbers<[1], [0], [0], [1], [0, 0, 1, 1], [], []>} : vector<16x8xbf16>, vector<8x256xbf16>, vector<16x256xf32> -> vector<16x256xf32>
    %c0_3 = arith.constant 0 : index
    %c0_4 = arith.constant 0 : index
    %3 = vector.load %arg3[%c0_3, %c0_4] : memref<1x256xf32, #tpu.memory_space<vmem>>, vector<1x256xf32>
    %4 = vector.broadcast %3 : vector<1x256xf32> to vector<16x256xf32>
    %5 = arith.addf %2, %4 : vector<16x256xf32>
    %cst_5 = arith.constant 0.000000e+00 : f32
    %6 = vector.broadcast %cst_5 : f32 to vector<16x256xf32>
    %7 = arith.maximumf %5, %6 : vector<16x256xf32>
    %8 = arith.truncf %7 : vector<16x256xf32> to vector<16x256xbf16>
    %c0_6 = arith.constant 0 : index
    %c0_7 = arith.constant 0 : index
    %9 = vector.load %arg4[%c0_6, %c0_7] : memref<256x256xbf16, #tpu.memory_space<vmem>>, vector<256x256xbf16>
    %cst_8 = arith.constant dense<0.000000e+00> : vector<16x256xf32>
    %10 = tpu.matmul %8, %9, %cst_8 {dimension_numbers = #tpu.dot_dimension_numbers<[1], [0], [0], [1], [0, 0, 1, 1], [], []>} : vector<16x256xbf16>, vector<256x256xbf16>, vector<16x256xf32> -> vector<16x256xf32>
    %c0_9 = arith.constant 0 : index
    %c0_10 = arith.constant 0 : index
    %11 = vector.load %arg5[%c0_9, %c0_10] : memref<1x256xf32, #tpu.memory_space<vmem>>, vector<1x256xf32>
    %12 = vector.broadcast %11 : vector<1x256xf32> to vector<16x256xf32>
    %13 = arith.addf %10, %12 : vector<16x256xf32>
    %cst_11 = arith.constant 0.000000e+00 : f32
    %14 = vector.broadcast %cst_11 : f32 to vector<16x256xf32>
    %15 = arith.maximumf %13, %14 : vector<16x256xf32>
    %16 = arith.truncf %15 : vector<16x256xf32> to vector<16x256xbf16>
    %c0_12 = arith.constant 0 : index
    %c0_13 = arith.constant 0 : index
    %17 = vector.load %arg6[%c0_12, %c0_13] : memref<256x128xbf16, #tpu.memory_space<vmem>>, vector<256x128xbf16>
    %cst_14 = arith.constant dense<0.000000e+00> : vector<16x128xf32>
    %18 = tpu.matmul %16, %17, %cst_14 {dimension_numbers = #tpu.dot_dimension_numbers<[1], [0], [0], [1], [0, 0, 1, 1], [], []>} : vector<16x256xbf16>, vector<256x128xbf16>, vector<16x128xf32> -> vector<16x128xf32>
    %c0_15 = arith.constant 0 : index
    %c0_16 = arith.constant 0 : index
    %19 = vector.load %arg7[%c0_15, %c0_16] : memref<1x128xf32, #tpu.memory_space<vmem>>, vector<1x128xf32>
    %20 = vector.broadcast %19 : vector<1x128xf32> to vector<16x128xf32>
    %21 = arith.addf %18, %20 : vector<16x128xf32>
    %22 = arith.truncf %21 : vector<16x128xf32> to vector<16x128xbf16>
    %c0_17 = arith.constant 0 : index
    %c0_18 = arith.constant 0 : index
    %23 = vector.load %arg8[%c0_17, %c0_18] : memref<16x128xbf16, #tpu.memory_space<vmem>>, vector<16x128xbf16>
    tpu.vector_store %arg8[%c0_17, %c0_18], %22 {strides = array<i32>} : memref<16x128xbf16, #tpu.memory_space<vmem>>, vector<16x128xbf16>,
    return
  }
  func.func @transform_0(%arg0: i32) -> (i32, i32) {
    %c0_i32 = arith.constant 0 : i32
    %c0_i32_0 = arith.constant 0 : i32
    return %arg0, %c0_i32 : i32, i32
  }
  func.func @transform_1(%arg0: i32) -> (i32, i32) {
    %c0_i32 = arith.constant 0 : i32
    %c0_i32_0 = arith.constant 0 : i32
    %c0_i32_1 = arith.constant 0 : i32
    return %c0_i32, %c0_i32_0 : i32, i32
  }
  func.func @transform_2(%arg0: i32) -> (i32, i32) {
    %c0_i32 = arith.constant 0 : i32
    %c0_i32_0 = arith.constant 0 : i32
    %c0_i32_1 = arith.constant 0 : i32
    return %c0_i32, %c0_i32_0 : i32, i32
  }
  func.func @transform_3(%arg0: i32) -> (i32, i32) {
    %c0_i32 = arith.constant 0 : i32
    %c0_i32_0 = arith.constant 0 : i32
    %c0_i32_1 = arith.constant 0 : i32
    return %c0_i32, %c0_i32_0 : i32, i32
  }
  func.func @transform_4(%arg0: i32) -> (i32, i32) {
    %c0_i32 = arith.constant 0 : i32
    %c0_i32_0 = arith.constant 0 : i32
    %c0_i32_1 = arith.constant 0 : i32
    return %c0_i32, %c0_i32_0 : i32, i32
  }
  func.func @transform_5(%arg0: i32) -> (i32, i32) {
    %c0_i32 = arith.constant 0 : i32
    %c0_i32_0 = arith.constant 0 : i32
    %c0_i32_1 = arith.constant 0 : i32
    return %c0_i32, %c0_i32_0 : i32, i32
  }
  func.func @transform_6(%arg0: i32) -> (i32, i32) {
    %c0_i32 = arith.constant 0 : i32
    %c0_i32_0 = arith.constant 0 : i32
    %c0_i32_1 = arith.constant 0 : i32
    return %c0_i32, %c0_i32_0 : i32, i32
  }
  func.func @transform_7(%arg0: i32) -> (i32, i32) {
    %c0_i32 = arith.constant 0 : i32
    %c0_i32_0 = arith.constant 0 : i32
    return %arg0, %c0_i32 : i32, i32
  }
}

</mosaic_0001>

<bundles_post_ra>
// kernel: tpu_custom_call.1
= control target key start
LH: loop header
LB: loop body
LE: loop exit
PB: predicated region body
PF: predicated region fallthrough
CT: control target
= control target key end

     0   :  { %12 = vsyncpa [#allocation3], 0  ;;  %s935_s0 = inlined_call_operand.vmem [shape: bf16[16,8], index: 0, kind: input, shape index: {}]   ;;  %s936_s1 = inlined_call_operand.vmem [shape: bf16[8,256], index: 1, kind: input, shape index: {}]   ;;  %s937_s2 = inlined_call_operand.vmem [shape: f32[1,256], index: 2, kind: input, shape index: {}]   ;;  %s938_s3 = inlined_call_operand.hbm [shape: bf16[256,256], index: 3, kind: input, shape index: {}]   ;;  %s939_s4 = inlined_call_operand.vmem [shape: f32[1,256], index: 4, kind: input, shape index: {}]   ;;  %s940_s5 = inlined_call_operand.hbm [shape: bf16[256,128], index: 5, kind: input, shape index: {}]   ;;  %s941_s6 = inlined_call_operand.vmem [shape: f32[1,128], index: 6, kind: input, shape index: {}]   ;;  %s942_s7 = inlined_call_operand.hbm [shape: bf16[16,128], index: 7, kind: output, shape index: {}]  }
   0x1   :  { %13 = vsyncpa [#allocation6], 0 }
   0x2   :  { %14 = vsyncpa [#allocation4], 0  ;;  %s830_s24 = smov [#allocation2]   ;;  %s758_s28 = scalar_lea.hbm %s938_s3, 4096 }
   0x3   :  { %s26_s25 = sshll.u32 %s830_s24, 4  ;;  %p759_p0 = scmp.ne.s32.totalorder %s938_s3, %s758_s28  ;;  %s27_s25 = int_to_ptr.vmem [resolvable:$true] %s26_s25 }
   0x4   :  { %p762_p1 = scmp.lt.u32.totalorder %s758_s28, %s938_s3 }
   0x6   :  { %p764_p2 = pnand %p762_p1, %p759_p0 }
   0x8   :  { %767 = shalt.err (!%p764_p2)
}
   0x9   :  { %s768_s10 = scalar_lea.vmem %s27_s25, 4096  ;;  %p773_p4 = scmp.lt.s32.totalorder %s27_s25, %s27_s25 }
   0xa   :  { %p769_p3 = scmp.ne.s32.totalorder %s27_s25, %s768_s10  ;;  %p774_p5 = scmp.lt.s32.totalorder %s768_s10, %s768_s10 }
   0xc   :  { %p775_p6 = por %p774_p5, %p773_p4 }
   0xe   :  { %p776_p7 = pnand %p775_p6, %p769_p3 }
  0x10   :  { %779 = shalt.err (!%p776_p7)
}
  0x11   :  { %s831_s11 = smov 128   ;;  %s832_s12 = smov 8  }
  0x12   :  { %32 = dma.hbm_to_vmem [thread:$0]  %s938_s3, 4096, %s27_s25, [#allocation3], %s831_s11, %s831_s11, %s832_s12  }
  0x13   :  { %s833_s15 = smov [#allocation5]   ;;  %s780_s19 = scalar_lea.hbm %s940_s5, 2048 }
  0x14   :  { %s40_s16 = sshll.u32 %s833_s15, 4  ;;  %p781_p8 = scmp.ne.s32.totalorder %s940_s5, %s780_s19  ;;  %s41_s16 = int_to_ptr.vmem [resolvable:$true] %s40_s16 }
  0x15   :  { %p784_p9 = scmp.lt.u32.totalorder %s780_s19, %s940_s5 }
  0x17   :  { %p786_p10 = pnand %p784_p9, %p781_p8 }
  0x19   :  { %789 = shalt.err (!%p786_p10)
}
  0x1a   :  { %s790_s24 = scalar_lea.vmem %s41_s16, 2048  ;;  %p795_p12 = scmp.lt.s32.totalorder %s41_s16, %s41_s16 }
  0x1b   :  { %p791_p11 = scmp.ne.s32.totalorder %s41_s16, %s790_s24  ;;  %p796_p13 = scmp.lt.s32.totalorder %s790_s24, %s790_s24 }
  0x1d   :  { %p797_p0 = por %p796_p13, %p795_p12 }
  0x1f   :  { %p798_p1 = pnand %p797_p0, %p791_p11 }
  0x21   :  { %801 = shalt.err (!%p798_p1)
}
  0x22   :  { %s834_s3 = smov 64   ;;  %s835_s25 = smov 4  }
  0x23   :  { %46 = dma.hbm_to_vmem [thread:$0]  %s940_s5, 2048, %s41_s16, [#allocation6], %s834_s3, %s834_s3, %s835_s25  }
  0x24   :  { %824 = dma.done.wait [#allocation3], 4096  }
  0x25   :  { %825 = vsyncadd [#allocation3], 4294963200 }
  0x26   :  { %826 = dma.done.wait [#allocation6], 2048  }
  0x27   :  { %827 = vsyncadd [#allocation6], 4294965248  ;;  %v836_v0 = vmov 0   ;;  %v58_v1 = vld [vmem:[%s936_s1] sm:$0xff]  ;;  %vm85_vm0 = vcmask 1043456   ;;  %vm81_vm1 = vcmask 64512   ;;  %v61_v49 = vlaneseq }
  0x28   :  { %124 = vmatprep.mubr.bf16.mxu0 %v836_v0  ;;  %v600_v2 = vcombine.high %v58_v1, %v58_v1  ;;  %v599_v3 = vcombine.low %v58_v1, %v58_v1  ;;  %v694_v4 = vld [vmem:[#allocation2 + $0x4] ss:$8 sps:$4 sm:$0xff]   ;;  %v696_v5 = vld [vmem:[#allocation2] ss:$8 sps:$4 sm:$0xff]   ;;  %v693_v7 = vld [vmem:[%s935_s0] sm:$0xff]   ;;  %s837_s10 = smov [#allocation7]  }
  0x29   :  { %v697_v8 = vld [vmem:[#allocation2 + $0x14] ss:$8 sps:$4 sm:$0xff]   ;;  %345 = vmatprep.subr.bf16.mxu1 %v694_v4  ;;  %v699_v9 = vld [vmem:[#allocation2 + $0x10] ss:$8 sps:$4 sm:$0xff]   ;;  %v700_v10 = vld [vmem:[#allocation2 + $0x24] ss:$8 sps:$4 sm:$0xff]  }
  0x2a   :  { %601 = vmatprep.subr.msk.bf16.mxu0 %vm85_vm0, %v600_v2  ;;  %v87_v6 = vsel %vm85_vm0, %v599_v3, 0  ;;  %346 = vmatpush1.bf16.msra.mxu1 %v696_v5  ;;  %v702_v11 = vld [vmem:[#allocation2 + $0x20] ss:$8 sps:$4 sm:$0xff]   ;;  %v703_v12 = vld [vmem:[#allocation2 + $0x34] ss:$8 sps:$4 sm:$0xff]   ;;  %v62_v50 = vshrl.u32 %v61_v49, 7 }
  0x2b   :  { %93 = vmatpush1.bf16.msra.mxu0 %v87_v6  ;;  %347 = vmatprep.subr.bf16.mxu1 %v697_v8  ;;  %v705_v13 = vld [vmem:[#allocation2 + $0x30] ss:$8 sps:$4 sm:$0xff]   ;;  %v706_v14 = vld [vmem:[#allocation2 + $0x44] ss:$8 sps:$4 sm:$0xff]   ;;  %v708_v15 = vld [vmem:[#allocation2 + $0x40] ss:$8 sps:$4 sm:$0xff]  }
  0x2c   :  { %v709_v16 = vld [vmem:[#allocation2 + $0x54] ss:$8 sps:$4 sm:$0xff]   ;;  %v711_v17 = vld [vmem:[#allocation2 + $0x50] ss:$8 sps:$4 sm:$0xff]   ;;  %v712_v18 = vld [vmem:[#allocation2 + $0x64] ss:$8 sps:$4 sm:$0xff]  }
  0x2d   :  { %v714_v19 = vld [vmem:[#allocation2 + $0x60] ss:$8 sps:$4 sm:$0xff]   ;;  %v715_v20 = vld [vmem:[#allocation2 + $0x74] ss:$8 sps:$4 sm:$0xff]   ;;  %v717_v21 = vld [vmem:[#allocation2 + $0x70] ss:$8 sps:$4 sm:$0xff]  }
  0x2e   :  { %602 = vmatmul.mubr.msk.bf16.vlgmr.msra.gmra.mrb[0].mxu0 %vm81_vm1, %v693_v7  ;;  %348 = vmatpush1.bf16.msra.mxu1 %v699_v9  ;;  %v718_v22 = vld [vmem:[#allocation2 + $0x84] ss:$8 sps:$4 sm:$0xff]   ;;  %v720_v23 = vld [vmem:[#allocation2 + $0x80] ss:$8 sps:$4 sm:$0xff]   ;;  %v721_v24 = vld [vmem:[#allocation2 + $0x94] ss:$8 sps:$4 sm:$0xff]  }
  0x2f   :  { %349 = vmatprep.subr.bf16.mxu1 %v700_v10  ;;  %v723_v25 = vld [vmem:[#allocation2 + $0x90] ss:$8 sps:$4 sm:$0xff]   ;;  %v724_v26 = vld [vmem:[#allocation2 + $0xa4] ss:$8 sps:$4 sm:$0xff]   ;;  %v726_v27 = vld [vmem:[#allocation2 + $0xa0] ss:$8 sps:$4 sm:$0xff]  }
  0x30   :  { %v727_v28 = vld [vmem:[#allocation2 + $0xb4] ss:$8 sps:$4 sm:$0xff]   ;;  %v729_v29 = vld [vmem:[#allocation2 + $0xb0] ss:$8 sps:$4 sm:$0xff]   ;;  %v730_v30 = vld [vmem:[#allocation2 + $0xc4] ss:$8 sps:$4 sm:$0xff]  }
  0x31   :  { %v732_v31 = vld [vmem:[#allocation2 + $0xc0] ss:$8 sps:$4 sm:$0xff]   ;;  %v733_v32 = vld [vmem:[#allocation2 + $0xd4] ss:$8 sps:$4 sm:$0xff]   ;;  %v735_v33 = vld [vmem:[#allocation2 + $0xd0] ss:$8 sps:$4 sm:$0xff]  }
  0x32   :  { %350 = vmatpush1.bf16.msra.mxu1 %v702_v11  ;;  %v736_v34 = vld [vmem:[#allocation2 + $0xe4] ss:$8 sps:$4 sm:$0xff]   ;;  %v738_v35 = vld [vmem:[#allocation2 + $0xe0] ss:$8 sps:$4 sm:$0xff]   ;;  %v739_v36 = vld [vmem:[#allocation2 + $0xf4] ss:$8 sps:$4 sm:$0xff]  }
  0x33   :  { %351 = vmatprep.subr.bf16.mxu1 %v703_v12  ;;  %v741_v37 = vld [vmem:[#allocation2 + $0xf0] ss:$8 sps:$4 sm:$0xff]   ;;  %v742_v38 = vld [vmem:[#allocation5 + $0x40] sm:$0xff]   ;;  %v744_v40 = vld [vmem:[#allocation5 + $0x48] sm:$0xff]   ;;  %v63_v51 = vsub.s32 0, %v62_v50  ;;  %v67_v53 = vsub.s32 1, %v62_v50 }
  0x34   :  { %v743_v39 = vld [vmem:[#allocation5] sm:$0xff]   ;;  %661 = vmatprep.subr.bf16.mxu0 %v742_v38  ;;  %v745_v41 = vld [vmem:[#allocation5 + $0x8] sm:$0xff]   ;;  %v746_v42 = vld [vmem:[#allocation5 + $0x50] sm:$0xff]   ;;  %s585_s11 = sshll.u32 %s837_s10, 4  ;;  %s586_s11 = int_to_ptr.vmem [resolvable:$true] %s585_s11 }
  0x35   :  { %662 = vmatpush3.bf16.msra.mxu0 %v743_v39  ;;  %v747_v43 = vld [vmem:[#allocation5 + $0x10] sm:$0xff]   ;;  %v748_v44 = vld [vmem:[#allocation5 + $0x58] sm:$0xff]   ;;  %v750_v46 = vld [vmem:[#allocation5 + $0x60] sm:$0xff]   ;;  %s802_s12 = scalar_lea.vmem %s586_s11, 128  ;;  %p807_p3 = scmp.lt.s32.totalorder %s586_s11, %s586_s11 }
  0x36   :  { %352 = vmatpush1.bf16.msra.mxu1 %v705_v13  ;;  %663 = vmatprep.subr.bf16.mxu0 %v744_v40  ;;  %v749_v45 = vld [vmem:[#allocation5 + $0x18] sm:$0xff]   ;;  %v751_v47 = vld [vmem:[#allocation5 + $0x20] sm:$0xff]   ;;  %v752_v48 = vld [vmem:[#allocation5 + $0x68] sm:$0xff]   ;;  %p803_p2 = scmp.ne.s32.totalorder %s586_s11, %s802_s12  ;;  %p808_p4 = scmp.lt.s32.totalorder %s802_s12, %s802_s12 }
  0x37   :  { %353 = vmatprep.subr.bf16.mxu1 %v706_v14  ;;  %v59_v52 = vld [vmem:[%s937_s2] sm:$0x3]  ;;  %v753_v6 = vld [vmem:[#allocation5 + $0x28] sm:$0xff]   ;;  %v754_v7 = vld [vmem:[#allocation5 + $0x70] sm:$0xff]  }
  0x38   :  { %v64_v54 = vrot.slane %v59_v52, %v63_v51  ;;  %v68_v55 = vrot.slane %v59_v52, %v67_v53  ;;  %v755_v8 = vld [vmem:[#allocation5 + $0x30] sm:$0xff]   ;;  %v756_v9 = vld [vmem:[#allocation5 + $0x78] sm:$0xff]   ;;  %p809_p5 = por %p808_p4, %p807_p3 }
  0x39   :  { %664 = vmatpush3.bf16.msra.mxu0 %v745_v41  ;;  %v757_v10 = vld [vmem:[#allocation5 + $0x38] sm:$0xff]  }
  0x3a   :  { %354 = vmatpush1.bf16.msra.mxu1 %v708_v15  ;;  %665 = vmatprep.subr.bf16.mxu0 %v746_v42  ;;  %v173_v11 = vld [vmem:[%s939_s4] sm:$0x3]  ;;  %p810_p6 = pnand %p809_p5, %p803_p2 }
  0x3b   :  { %355 = vmatprep.subr.bf16.mxu1 %v709_v16  ;;  %v178_v12 = vrot.slane %v173_v11, %v63_v51  ;;  %v182_v13 = vrot.slane %v173_v11, %v67_v53 }
  0x3d   :  { %666 = vmatpush3.bf16.msra.mxu0 %v747_v43 }
  0x3e   :  { %356 = vmatpush1.bf16.msra.mxu1 %v711_v17  ;;  %667 = vmatprep.subr.bf16.mxu0 %v748_v44 }
  0x3f   :  { %357 = vmatprep.subr.bf16.mxu1 %v712_v18 }
  0x41   :  { %668 = vmatpush3.bf16.msra.mxu0 %v749_v45 }
  0x42   :  { %358 = vmatpush1.bf16.msra.mxu1 %v714_v19  ;;  %669 = vmatprep.subr.bf16.mxu0 %v750_v46 }
  0x43   :  { %359 = vmatprep.subr.bf16.mxu1 %v715_v20 }
  0x45   :  { %670 = vmatpush3.bf16.msra.mxu0 %v751_v47 }
  0x46   :  { %360 = vmatpush1.bf16.msra.mxu1 %v717_v21  ;;  %671 = vmatprep.subr.bf16.mxu0 %v752_v48 }
  0x47   :  { %361 = vmatprep.subr.bf16.mxu1 %v718_v22 }
  0x49   :  { %672 = vmatpush3.bf16.msra.mxu0 %v753_v6 }
  0x4a   :  { %362 = vmatpush1.bf16.msra.mxu1 %v720_v23  ;;  %673 = vmatprep.subr.bf16.mxu0 %v754_v7 }
  0x4b   :  { %363 = vmatprep.subr.bf16.mxu1 %v721_v24 }
  0x4d   :  { %674 = vmatpush3.bf16.msra.mxu0 %v755_v8 }
  0x4e   :  { %364 = vmatpush1.bf16.msra.mxu1 %v723_v25  ;;  %675 = vmatprep.subr.bf16.mxu0 %v756_v9 }
  0x4f   :  { %365 = vmatprep.subr.bf16.mxu1 %v724_v26 }
  0x51   :  { %676 = vmatpush3.bf16.msra.mxu0 %v757_v10 }
  0x52   :  { %366 = vmatpush1.bf16.msra.mxu1 %v726_v27 }
  0x53   :  { %367 = vmatprep.subr.bf16.mxu1 %v727_v28 }
  0x56   :  { %368 = vmatpush1.bf16.msra.mxu1 %v729_v29 }
  0x57   :  { %369 = vmatprep.subr.bf16.mxu1 %v730_v30 }
  0x5a   :  { %370 = vmatpush1.bf16.msra.mxu1 %v732_v31 }
  0x5b   :  { %371 = vmatprep.subr.bf16.mxu1 %v733_v32  ;;  %v635_v32 = vld [vmem:[%s941_s6] ss:$0 sm:$0xff] }
  0x5e   :  { %372 = vmatpush1.bf16.msra.mxu1 %v735_v33 }
  0x5f   :  { %373 = vmatprep.subr.bf16.mxu1 %v736_v34 }
  0x62   :  { %374 = vmatpush1.bf16.msra.mxu1 %v738_v35 }
  0x63   :  { %375 = vmatprep.subr.bf16.mxu1 %v739_v36 }
  0x66   :  { %376 = vmatpush1.bf16.msra.mxu1 %v741_v37 }
 0x101   :  { %v126_v56 = vpop.f32.mrb[0].mxu0 }
 0x102   :  { %v127_v57 = vadd.f32 %v126_v56, %v64_v54  ;;  %v128_v58 = vpop.f32.mrb[1].mxu0 }
 0x103   :  { %v129_v59 = vadd.f32 %v128_v58, %v68_v55  ;;  %v130_v60 = vpop.f32.mrb[2].mxu0 }
 0x104   :  { %v131_v61 = vadd.f32 %v130_v60, %v64_v54  ;;  %v132_v62 = vpop.f32.mrb[3].mxu0  ;;  %v135_v0 = vmax.f32 %v127_v57, 0.0 }
 0x105   :  { %v133_v63 = vadd.f32 %v132_v62, %v68_v55  ;;  %v136_v2 = vmax.f32 %v129_v59, 0.0 }
 0x106   :  { %v137_v1 = vmax.f32 %v131_v61, 0.0 }
 0x107   :  { %v138_v3 = vmax.f32 %v133_v63, 0.0 }
 0x108   :  { %v139_v4 = vpack.c.bf16 %v137_v1, %v135_v0 }
 0x109   :  { %v140_v5 = vpack.c.bf16 %v138_v3, %v136_v2 }
 0x10b   :  { %377 = vmatprep.mubr.bf16.mxu1 %v140_v5 }
 0x10c   :  { %378 = vmatmul.mubr.bf16.vlgmr.msra.gmra.mrb[0].mxu1 %v139_v4 }
 0x1df   :  { %v379_v14 = vpop.f32.mrb[0].mxu1 }
 0x1e0   :  { %v380_v15 = vadd.f32 %v379_v14, %v178_v12  ;;  %v381_v16 = vpop.f32.mrb[1].mxu1 }
 0x1e1   :  { %v382_v17 = vadd.f32 %v381_v16, %v182_v13  ;;  %v383_v18 = vpop.f32.mrb[2].mxu1 }
 0x1e2   :  { %v384_v19 = vadd.f32 %v383_v18, %v178_v12  ;;  %v385_v20 = vpop.f32.mrb[3].mxu1  ;;  %v388_v22 = vmax.f32 %v380_v15, 0.0 }
 0x1e3   :  { %v386_v21 = vadd.f32 %v385_v20, %v182_v13  ;;  %v389_v24 = vmax.f32 %v382_v17, 0.0 }
 0x1e4   :  { %v390_v23 = vmax.f32 %v384_v19, 0.0 }
 0x1e5   :  { %v391_v25 = vmax.f32 %v386_v21, 0.0 }
 0x1e6   :  { %v392_v26 = vpack.c.bf16 %v390_v23, %v388_v22 }
 0x1e7   :  { %v393_v27 = vpack.c.bf16 %v391_v25, %v389_v24 }
 0x1e9   :  { %561 = vmatprep.mubr.bf16.mxu0 %v393_v27 }
 0x1ea   :  { %562 = vmatmul.mubr.bf16.vlgmr.msra.gmra.mrb[4].mxu0 %v392_v26 }
 0x2bd   :  { %v677_v28 = vpop.f32.mrb[4].mxu0 }
 0x2be   :  { %v678_v29 = vpop.f32.mrb[5].mxu0 }
 0x2bf   :  { %v679_v30 = vadd.f32 %v678_v29, %v677_v28  ;;  %v680_v31 = vpop.f32.mrb[6].mxu0 }
 0x2c0   :  { %v681_v33 = vpop.f32.mrb[7].mxu0 }
 0x2c1   :  { %v682_v34 = vadd.f32 %v681_v33, %v680_v31  ;;  %v564_v35 = vadd.f32 %v679_v30, %v635_v32 }
 0x2c3   :  { %v567_v36 = vadd.f32 %v682_v34, %v635_v32 }
 0x2c5   :  { %v659_v37 = vpack.c.bf16 %v567_v36, %v564_v35 }
 0x2c7   :  { %660 = vst [vmem:[#allocation7] sm:$0xff] %v659_v37  }
 0x2c8   :  { %813 = shalt.err (!%p810_p6)
}
 0x2c9   :  { %s814_s6 = scalar_lea.hbm %s942_s7, 128 }
 0x2ca   :  { %p815_p7 = scmp.ne.s32.totalorder %s942_s7, %s814_s6  ;;  %p818_p8 = scmp.lt.u32.totalorder %s814_s6, %s942_s7 }
 0x2cc   :  { %p820_p9 = pnand %p818_p8, %p815_p7 }
 0x2ce   :  { %823 = shalt.err (!%p820_p9)
}
 0x2cf   :  { %591 = dma.vmem_to_hbm [thread:$0]  %s586_s11, 128, %s942_s7, [#allocation4], %s834_s3, %s834_s3, %s835_s25  }
 0x2d0   :  { %828 = dma.done.wait [#allocation4], 128  }
 0x2d1   :  { %829 = vsyncadd [#allocation4], 4294967168 }
 0x2d2   :  { %595 = vsyncpa [#allocation3], 1 }
 0x2d3   :  { %596 = vsyncpa [#allocation6], 1 }
 0x2d4   :  { %597 = vsyncpa [#allocation4], 1 }

</bundles_post_ra>
